<compile_context>
chip_gen: v5e
topology: v5e:2x2
jax: 0.10.0
libtpu: 0.0.40
codegen_flags: <defaults>
</compile_context>

<pallas_src>
import jax
import jax.numpy as jnp
from jax.experimental import pallas as pl
from jax.experimental.pallas import tpu as pltpu


def _round_up(x, m):
    return (x + m - 1) // m * m


def v_net_kernel(obs_ref, act_ref,
                 w_obs_ref, b_obs_ref, w_act_ref, b_act_ref,
                 w2_obs_ref, w2_act_ref, b2_ref,
                 w_out_ref, b_out_ref, out_ref):
    """Feature-major fused forward.

    Activations are (features, tile_b): 4 small MXU matmuls (bf16 in, f32 acc),
    f32 bias/ReLU on the VPU, and an H->1 head as a sublane (XLU) reduce that
    writes a lane-dense (1, tile_b) output row.
    """
    cdt = w_obs_ref.dtype                                   # bf16 compute dtype

    obs_t = obs_ref[...].astype(cdt)                        # (N_obs, TB)
    act_t = act_ref[...].astype(cdt)                        # (N_act, TB)

    # Layer 1 (per branch): (H, N_x) @ (N_x, TB) -> (H, TB), f32 accumulate.
    h_obs = (jnp.dot(w_obs_ref[...], obs_t,
                     preferred_element_type=jnp.float32) + b_obs_ref[...])
    h_act = (jnp.dot(w_act_ref[...], act_t,
                     preferred_element_type=jnp.float32) + b_act_ref[...])
    x_obs = jnp.maximum(h_obs, 0.0).astype(cdt)
    x_act = jnp.maximum(h_act, 0.0).astype(cdt)

    # Layer 2: sum of the two hidden branches, combined bias. (H, TB) f32.
    h2 = (jnp.dot(w2_obs_ref[...], x_obs, preferred_element_type=jnp.float32)
          + jnp.dot(w2_act_ref[...], x_act, preferred_element_type=jnp.float32)
          + b2_ref[...])
    x2 = jnp.maximum(h2, 0.0)

    # Output head (H -> 1): sublane reduce => lane-dense (1, TB) row.
    v = jnp.sum(x2 * w_out_ref[...], axis=0, keepdims=True) + b_out_ref[...]
    out_ref[...] = v.astype(out_ref.dtype)


def v_net_forward(obs, act, fp, *, tile_b=None):
    """Tiled-over-batch pallas_call; weights stay VMEM-resident across tiles.

    obs: (B, N_obs) f32, act: (B, N_act) f32.  Returns (B, 1) f32.
    """
    B, n_obs = obs.shape
    n_act = act.shape[1]
    h = fp["w_obs"].shape[0]

    # Feature-major inputs: batch on the lane axis (no 24->128 lane padding).
    obs_t = obs.astype(jnp.float32).T                        # (N_obs, B)
    act_t = act.astype(jnp.float32).T                        # (N_act, B)

    # 16K rows/tile is ~20 MiB peak VMEM (incl. temporaries): safe on every
    # generation incl. v7x (64 MiB).  v5e/v6e could go larger.
    MAX_TILE_B = 16384
    if tile_b is None:
        tile_b = B if B <= MAX_TILE_B else MAX_TILE_B

    if tile_b >= B:
        tile_b = B                         # single tile, full-dim block, no pad
        b_pad = B
    else:
        tile_b = _round_up(tile_b, 128)    # lane-tile multiple when tiling
        b_pad = _round_up(B, tile_b)
        if b_pad != B:
            obs_t = jnp.pad(obs_t, ((0, 0), (0, b_pad - B)))
            act_t = jnp.pad(act_t, ((0, 0), (0, b_pad - B)))

    grid = (b_pad // tile_b,)

    out = pl.pallas_call(
        v_net_kernel,
        out_shape=jax.ShapeDtypeStruct((1, b_pad), jnp.float32),
        grid=grid,
        in_specs=[
            pl.BlockSpec((n_obs, tile_b), lambda i: (0, i)),   # obs (streamed)
            pl.BlockSpec((n_act, tile_b), lambda i: (0, i)),   # act (streamed)
            pl.BlockSpec((h, n_obs), lambda i: (0, 0)),        # w_obs  (pinned)
            pl.BlockSpec((h, 1), lambda i: (0, 0)),            # b_obs  (pinned)
            pl.BlockSpec((h, n_act), lambda i: (0, 0)),        # w_act  (pinned)
            pl.BlockSpec((h, 1), lambda i: (0, 0)),            # b_act  (pinned)
            pl.BlockSpec((h, h), lambda i: (0, 0)),            # w2_obs (pinned)
            pl.BlockSpec((h, h), lambda i: (0, 0)),            # w2_act (pinned)
            pl.BlockSpec((h, 1), lambda i: (0, 0)),            # b2     (pinned)
            pl.BlockSpec((h, 1), lambda i: (0, 0)),            # w_out  (pinned)
            pl.BlockSpec((1, 1), lambda i: (0, 0)),            # b_out  (pinned)
        ],
        out_specs=pl.BlockSpec((1, tile_b), lambda i: (0, i)),  # lane-dense row
        compiler_params=pltpu.CompilerParams(
            dimension_semantics=("parallel",),
            vmem_limit_bytes=48 * 1024 * 1024,
        ),
    )(obs_t, act_t,
      fp["w_obs"], fp["b_obs"], fp["w_act"], fp["b_act"],
      fp["w2_obs"], fp["w2_act"], fp["b2"], fp["w_out"], fp["b_out"])

    # Slice off padded lanes (if any) and return batch-major (B, 1).
    return out[:, :B].T


def init_params(key, n_obs, n_act, n_hidden):
    """PyTorch-style Linear init: U(-1/sqrt(fan_in), +1/sqrt(fan_in))."""
    def linear(k, fan_in, fan_out):
        k1, k2 = jax.random.split(k)
        bound = 1.0 / float(jnp.sqrt(fan_in))
        w = jax.random.uniform(k1, (fan_in, fan_out), jnp.float32, -bound, bound)
        b = jax.random.uniform(k2, (1, fan_out), jnp.float32, -bound, bound)
        return w, b

    keys = jax.random.split(key, 5)
    p = {}
    p["w_obs"], p["b_obs"] = linear(keys[0], n_obs, n_hidden)
    p["w_act"], p["b_act"] = linear(keys[1], n_act, n_hidden)
    p["w_obs_hid"], p["b_obs_hid"] = linear(keys[2], n_hidden, n_hidden)
    p["w_act_hid"], p["b_act_hid"] = linear(keys[3], n_hidden, n_hidden)
    p["w_out"], p["b_out"] = linear(keys[4], n_hidden, 1)
    return p


def prep_params(p, compute_dtype=jnp.bfloat16):
    """One-time prep: feature-major (transposed) weights for the kernel."""
    return {
        "w_obs": p["w_obs"].T.astype(compute_dtype),            # (H, N_obs)
        "b_obs": p["b_obs"].T.astype(jnp.float32),               # (H, 1)
        "w_act": p["w_act"].T.astype(compute_dtype),             # (H, N_act)
        "b_act": p["b_act"].T.astype(jnp.float32),               # (H, 1)
        "w2_obs": p["w_obs_hid"].T.astype(compute_dtype),        # (H, H)
        "w2_act": p["w_act_hid"].T.astype(compute_dtype),        # (H, H)
        "b2": (p["b_obs_hid"] + p["b_act_hid"]).T.astype(jnp.float32),  # (H, 1)
        "w_out": p["w_out"].astype(jnp.float32),                 # (H, 1)
        "b_out": p["b_out"].astype(jnp.float32),                 # (1, 1)
    }


def v_net_reference(obs, act, p, compute_dtype=jnp.float32):
    """Pure-JAX reference mirroring the PyTorch forward (same matmul dtype)."""
    c = lambda a: a.astype(compute_dtype)
    x_obs = jax.nn.relu(
        jnp.dot(c(obs), c(p["w_obs"]), preferred_element_type=jnp.float32)
        + p["b_obs"])
    h_obs = (jnp.dot(c(x_obs), c(p["w_obs_hid"]),
                     preferred_element_type=jnp.float32) + p["b_obs_hid"])
    x_act = jax.nn.relu(
        jnp.dot(c(act), c(p["w_act"]), preferred_element_type=jnp.float32)
        + p["b_act"])
    h_act = (jnp.dot(c(x_act), c(p["w_act_hid"]),
                     preferred_element_type=jnp.float32) + p["b_act_hid"])
    x_hid = jax.nn.relu(h_obs + h_act)
    return (jnp.dot(x_hid, p["w_out"], preferred_element_type=jnp.float32)
            + p["b_out"])


if __name__ == "__main__":
    N_OBS, N_ACT, N_HIDDEN = 16, 8, 32

    key = jax.random.PRNGKey(0)
    k_obs, k_act, k_params = jax.random.split(key, 3)
    params = init_params(k_params, N_OBS, N_ACT, N_HIDDEN)
    fused = prep_params(params, compute_dtype=jnp.bfloat16)

    # Small batch: single full-extent tile (no padding).
    B = 8
    obs = jax.random.normal(k_obs, (B, N_OBS), jnp.float32)
    act = jax.random.normal(k_act, (B, N_ACT), jnp.float32)
    out = jax.block_until_ready(v_net_forward(obs, act, fused))
    ref = v_net_reference(obs, act, params, compute_dtype=jnp.bfloat16)
    assert out.shape == (B, 1), out.shape
    assert jnp.allclose(out, ref, atol=5e-3, rtol=5e-3), (
        "mismatch vs reference: max abs diff = %s" % jnp.max(jnp.abs(out - ref)))

    # Exercise the tiled + padded path (partial final tile sliced off).
    B2 = 300
    obs2 = jax.random.normal(jax.random.fold_in(k_obs, 1), (B2, N_OBS), jnp.float32)
    act2 = jax.random.normal(jax.random.fold_in(k_act, 1), (B2, N_ACT), jnp.float32)
    out2 = jax.block_until_ready(v_net_forward(obs2, act2, fused, tile_b=128))
    ref2 = v_net_reference(obs2, act2, params, compute_dtype=jnp.bfloat16)
    assert out2.shape == (B2, 1), out2.shape
    assert jnp.allclose(out2, ref2, atol=5e-3, rtol=5e-3), (
        "tiled mismatch vs reference: max abs diff = %s"
        % jnp.max(jnp.abs(out2 - ref2)))

    print("KERNEL_OK")
</pallas_src>

<mosaic_0001>
module attributes {stable_mosaic.version = 11 : i64} {
  func.func @v_net_kernel(%arg0: i32, %arg1: memref<16x8xf32, #tpu.memory_space<vmem>>, %arg2: memref<8x8xf32, #tpu.memory_space<vmem>>, %arg3: memref<32x16xbf16, #tpu.memory_space<vmem>>, %arg4: memref<32x1xf32, #tpu.memory_space<vmem>>, %arg5: memref<32x8xbf16, #tpu.memory_space<vmem>>, %arg6: memref<32x1xf32, #tpu.memory_space<vmem>>, %arg7: memref<32x32xbf16, #tpu.memory_space<vmem>>, %arg8: memref<32x32xbf16, #tpu.memory_space<vmem>>, %arg9: memref<32x1xf32, #tpu.memory_space<vmem>>, %arg10: memref<32x1xf32, #tpu.memory_space<vmem>>, %arg11: memref<1x1xf32, #tpu.memory_space<vmem>>, %arg12: memref<1x8xf32, #tpu.memory_space<vmem>>) attributes {dimension_semantics = [#tpu.dimension_semantics<parallel>], iteration_bounds = array<i64: 1>, scalar_prefetch = 0 : i64, scratch_operands = 0 : i64, tpu.core_type = #tpu.core_type<tc>, window_params = [{transform_indices = @transform_0, window_bounds = array<i64: 16, 8>}, {transform_indices = @transform_1, window_bounds = array<i64: 8, 8>}, {pipeline_mode = #tpu.pipeline_mode<synchronous>, transform_indices = @transform_2, window_bounds = array<i64: 32, 16>}, {pipeline_mode = #tpu.pipeline_mode<synchronous>, transform_indices = @transform_3, window_bounds = array<i64: 32, 1>}, {pipeline_mode = #tpu.pipeline_mode<synchronous>, transform_indices = @transform_4, window_bounds = array<i64: 32, 8>}, {pipeline_mode = #tpu.pipeline_mode<synchronous>, transform_indices = @transform_5, window_bounds = array<i64: 32, 1>}, {pipeline_mode = #tpu.pipeline_mode<synchronous>, transform_indices = @transform_6, window_bounds = array<i64: 32, 32>}, {pipeline_mode = #tpu.pipeline_mode<synchronous>, transform_indices = @transform_7, window_bounds = array<i64: 32, 32>}, {pipeline_mode = #tpu.pipeline_mode<synchronous>, transform_indices = @transform_8, window_bounds = array<i64: 32, 1>}, {pipeline_mode = #tpu.pipeline_mode<synchronous>, transform_indices = @transform_9, window_bounds = array<i64: 32, 1>}, {pipeline_mode = #tpu.pipeline_mode<synchronous>, transform_indices = @transform_10, window_bounds = array<i64: 1, 1>}, {transform_indices = @transform_11, window_bounds = array<i64: 1, 8>}]} {
    %c0 = arith.constant 0 : index
    %c0_0 = arith.constant 0 : index
    %0 = vector.load %arg1[%c0, %c0_0] : memref<16x8xf32, #tpu.memory_space<vmem>>, vector<16x8xf32>
    %1 = arith.truncf %0 : vector<16x8xf32> to vector<16x8xbf16>
    %c0_1 = arith.constant 0 : index
    %c0_2 = arith.constant 0 : index
    %2 = vector.load %arg2[%c0_1, %c0_2] : memref<8x8xf32, #tpu.memory_space<vmem>>, vector<8x8xf32>
    %3 = arith.truncf %2 : vector<8x8xf32> to vector<8x8xbf16>
    %c0_3 = arith.constant 0 : index
    %c0_4 = arith.constant 0 : index
    %4 = vector.load %arg3[%c0_3, %c0_4] : memref<32x16xbf16, #tpu.memory_space<vmem>>, vector<32x16xbf16>
    %cst = arith.constant dense<0.000000e+00> : vector<32x8xf32>
    %5 = tpu.matmul %4, %1, %cst {dimension_numbers = #tpu.dot_dimension_numbers<[1], [0], [0], [1], [0, 0, 1, 1], [], []>} : vector<32x16xbf16>, vector<16x8xbf16>, vector<32x8xf32> -> vector<32x8xf32>
    %c0_5 = arith.constant 0 : index
    %c0_6 = arith.constant 0 : index
    %6 = vector.load %arg4[%c0_5, %c0_6] : memref<32x1xf32, #tpu.memory_space<vmem>>, vector<32x1xf32>
    %7 = vector.broadcast %6 : vector<32x1xf32> to vector<32x8xf32>
    %8 = arith.addf %5, %7 : vector<32x8xf32>
    %c0_7 = arith.constant 0 : index
    %c0_8 = arith.constant 0 : index
    %9 = vector.load %arg5[%c0_7, %c0_8] : memref<32x8xbf16, #tpu.memory_space<vmem>>, vector<32x8xbf16>
    %cst_9 = arith.constant dense<0.000000e+00> : vector<32x8xf32>
    %10 = tpu.matmul %9, %3, %cst_9 {dimension_numbers = #tpu.dot_dimension_numbers<[1], [0], [0], [1], [0, 0, 1, 1], [], []>} : vector<32x8xbf16>, vector<8x8xbf16>, vector<32x8xf32> -> vector<32x8xf32>
    %c0_10 = arith.constant 0 : index
    %c0_11 = arith.constant 0 : index
    %11 = vector.load %arg6[%c0_10, %c0_11] : memref<32x1xf32, #tpu.memory_space<vmem>>, vector<32x1xf32>
    %12 = vector.broadcast %11 : vector<32x1xf32> to vector<32x8xf32>
    %13 = arith.addf %10, %12 : vector<32x8xf32>
    %cst_12 = arith.constant 0.000000e+00 : f32
    %14 = vector.broadcast %cst_12 : f32 to vector<32x8xf32>
    %15 = arith.maximumf %8, %14 : vector<32x8xf32>
    %16 = arith.truncf %15 : vector<32x8xf32> to vector<32x8xbf16>
    %cst_13 = arith.constant 0.000000e+00 : f32
    %17 = vector.broadcast %cst_13 : f32 to vector<32x8xf32>
    %18 = arith.maximumf %13, %17 : vector<32x8xf32>
    %19 = arith.truncf %18 : vector<32x8xf32> to vector<32x8xbf16>
    %c0_14 = arith.constant 0 : index
    %c0_15 = arith.constant 0 : index
    %20 = vector.load %arg7[%c0_14, %c0_15] : memref<32x32xbf16, #tpu.memory_space<vmem>>, vector<32x32xbf16>
    %cst_16 = arith.constant dense<0.000000e+00> : vector<32x8xf32>
    %21 = tpu.matmul %20, %16, %cst_16 {dimension_numbers = #tpu.dot_dimension_numbers<[1], [0], [0], [1], [0, 0, 1, 1], [], []>} : vector<32x32xbf16>, vector<32x8xbf16>, vector<32x8xf32> -> vector<32x8xf32>
    %c0_17 = arith.constant 0 : index
    %c0_18 = arith.constant 0 : index
    %22 = vector.load %arg8[%c0_17, %c0_18] : memref<32x32xbf16, #tpu.memory_space<vmem>>, vector<32x32xbf16>
    %cst_19 = arith.constant dense<0.000000e+00> : vector<32x8xf32>
    %23 = tpu.matmul %22, %19, %cst_19 {dimension_numbers = #tpu.dot_dimension_numbers<[1], [0], [0], [1], [0, 0, 1, 1], [], []>} : vector<32x32xbf16>, vector<32x8xbf16>, vector<32x8xf32> -> vector<32x8xf32>
    %24 = arith.addf %21, %23 : vector<32x8xf32>
    %c0_20 = arith.constant 0 : index
    %c0_21 = arith.constant 0 : index
    %25 = vector.load %arg9[%c0_20, %c0_21] : memref<32x1xf32, #tpu.memory_space<vmem>>, vector<32x1xf32>
    %26 = vector.broadcast %25 : vector<32x1xf32> to vector<32x8xf32>
    %27 = arith.addf %24, %26 : vector<32x8xf32>
    %cst_22 = arith.constant 0.000000e+00 : f32
    %28 = vector.broadcast %cst_22 : f32 to vector<32x8xf32>
    %29 = arith.maximumf %27, %28 : vector<32x8xf32>
    %c0_23 = arith.constant 0 : index
    %c0_24 = arith.constant 0 : index
    %30 = vector.load %arg10[%c0_23, %c0_24] : memref<32x1xf32, #tpu.memory_space<vmem>>, vector<32x1xf32>
    %31 = vector.broadcast %30 : vector<32x1xf32> to vector<32x8xf32>
    %32 = arith.mulf %29, %31 : vector<32x8xf32>
    %cst_25 = arith.constant dense<0.000000e+00> : vector<8xf32>
    %33 = vector.multi_reduction <add>, %32, %cst_25 [0] : vector<32x8xf32> to vector<8xf32>
    %34 = vector.shape_cast %33 : vector<8xf32> to vector<1x8xf32>
    %c0_26 = arith.constant 0 : index
    %c0_27 = arith.constant 0 : index
    %35 = vector.load %arg11[%c0_26, %c0_27] : memref<1x1xf32, #tpu.memory_space<vmem>>, vector<1x1xf32>
    %36 = vector.broadcast %35 : vector<1x1xf32> to vector<1x8xf32>
    %37 = arith.addf %34, %36 : vector<1x8xf32>
    %c0_28 = arith.constant 0 : index
    %c0_29 = arith.constant 0 : index
    %38 = vector.load %arg12[%c0_28, %c0_29] : memref<1x8xf32, #tpu.memory_space<vmem>>, vector<1x8xf32>
    tpu.vector_store %arg12[%c0_28, %c0_29], %37 {strides = array<i32>} : memref<1x8xf32, #tpu.memory_space<vmem>>, vector<1x8xf32>,
    return
  }
  func.func @transform_0(%arg0: i32) -> (i32, i32) {
    %c0_i32 = arith.constant 0 : i32
    %c0_i32_0 = arith.constant 0 : i32
    return %c0_i32, %arg0 : i32, i32
  }
  func.func @transform_1(%arg0: i32) -> (i32, i32) {
    %c0_i32 = arith.constant 0 : i32
    %c0_i32_0 = arith.constant 0 : i32
    return %c0_i32, %arg0 : i32, i32
  }
  func.func @transform_2(%arg0: i32) -> (i32, i32) {
    %c0_i32 = arith.constant 0 : i32
    %c0_i32_0 = arith.constant 0 : i32
    %c0_i32_1 = arith.constant 0 : i32
    return %c0_i32, %c0_i32_0 : i32, i32
  }
  func.func @transform_3(%arg0: i32) -> (i32, i32) {
    %c0_i32 = arith.constant 0 : i32
    %c0_i32_0 = arith.constant 0 : i32
    %c0_i32_1 = arith.constant 0 : i32
    return %c0_i32, %c0_i32_0 : i32, i32
  }
  func.func @transform_4(%arg0: i32) -> (i32, i32) {
    %c0_i32 = arith.constant 0 : i32
    %c0_i32_0 = arith.constant 0 : i32
    %c0_i32_1 = arith.constant 0 : i32
    return %c0_i32, %c0_i32_0 : i32, i32
  }
  func.func @transform_5(%arg0: i32) -> (i32, i32) {
    %c0_i32 = arith.constant 0 : i32
    %c0_i32_0 = arith.constant 0 : i32
    %c0_i32_1 = arith.constant 0 : i32
    return %c0_i32, %c0_i32_0 : i32, i32
  }
  func.func @transform_6(%arg0: i32) -> (i32, i32) {
    %c0_i32 = arith.constant 0 : i32
    %c0_i32_0 = arith.constant 0 : i32
    %c0_i32_1 = arith.constant 0 : i32
    return %c0_i32, %c0_i32_0 : i32, i32
  }
  func.func @transform_7(%arg0: i32) -> (i32, i32) {
    %c0_i32 = arith.constant 0 : i32
    %c0_i32_0 = arith.constant 0 : i32
    %c0_i32_1 = arith.constant 0 : i32
    return %c0_i32, %c0_i32_0 : i32, i32
  }
  func.func @transform_8(%arg0: i32) -> (i32, i32) {
    %c0_i32 = arith.constant 0 : i32
    %c0_i32_0 = arith.constant 0 : i32
    %c0_i32_1 = arith.constant 0 : i32
    return %c0_i32, %c0_i32_0 : i32, i32
  }
  func.func @transform_9(%arg0: i32) -> (i32, i32) {
    %c0_i32 = arith.constant 0 : i32
    %c0_i32_0 = arith.constant 0 : i32
    %c0_i32_1 = arith.constant 0 : i32
    return %c0_i32, %c0_i32_0 : i32, i32
  }
  func.func @transform_10(%arg0: i32) -> (i32, i32) {
    %c0_i32 = arith.constant 0 : i32
    %c0_i32_0 = arith.constant 0 : i32
    %c0_i32_1 = arith.constant 0 : i32
    return %c0_i32, %c0_i32_0 : i32, i32
  }
  func.func @transform_11(%arg0: i32) -> (i32, i32) {
    %c0_i32 = arith.constant 0 : i32
    %c0_i32_0 = arith.constant 0 : i32
    return %c0_i32, %arg0 : i32, i32
  }
}

</mosaic_0001>

<bundles_post_ra>
// kernel: tpu_custom_call.1
= control target key start
LH: loop header
LB: loop body
LE: loop exit
PB: predicated region body
PF: predicated region fallthrough
CT: control target
= control target key end

     0   :  { %s605_s0 = inlined_call_operand.vmem [shape: f32[16,8], index: 0, kind: input, shape index: {}]   ;;  %s606_s1 = inlined_call_operand.vmem [shape: f32[8,8], index: 1, kind: input, shape index: {}]   ;;  %s607_s2 = inlined_call_operand.vmem [shape: bf16[32,16], index: 2, kind: input, shape index: {}]   ;;  %s608_s3 = inlined_call_operand.vmem [shape: f32[32,1], index: 3, kind: input, shape index: {}]   ;;  %s609_s4 = inlined_call_operand.vmem [shape: bf16[32,8], index: 4, kind: input, shape index: {}]   ;;  %s610_s5 = inlined_call_operand.vmem [shape: f32[32,1], index: 5, kind: input, shape index: {}]   ;;  %s611_s6 = inlined_call_operand.vmem [shape: bf16[32,32], index: 6, kind: input, shape index: {}]   ;;  %s612_s7 = inlined_call_operand.vmem [shape: bf16[32,32], index: 7, kind: input, shape index: {}]   ;;  %s613_s8 = inlined_call_operand.vmem [shape: f32[32,1], index: 8, kind: input, shape index: {}]   ;;  %s614_s9 = inlined_call_operand.vmem [shape: f32[32,1], index: 9, kind: input, shape index: {}]   ;;  %s615_s10 = inlined_call_operand.<no memory space> [shape: f32[1,1], index: 10, kind: input, shape index: {}]   ;;  %s616_s11 = inlined_call_operand.hbm [shape: f32[1,8], index: 11, kind: output, shape index: {}]  }
   0x1   :  { %v16_v0 = vstv %s615_s10 }
   0x2   :  { %17 = vst [vmem:[#allocation2] sm:$0x1] %v16_v0 }
   0x3   :  { %v117_v1 = vld [vmem:[%s610_s5 + $0x10] sm:$0xff]  ;;  %v42_v3 = vld [vmem:[%s605_s0] sm:$0xff]  ;;  %v448_v4 = vmov 0   ;;  %v43_v5 = vld [vmem:[%s605_s0 + $0x8] sm:$0xff]  ;;  %vm156_vm0 = vcmask 1043456   ;;  %vm85_vm1 = vcmask 130048  }
   0x4   :  { %v53_v2 = vld [vmem:[%s608_s3 + $0x10] sm:$0xff]  ;;  %420 = vset.pattern.permute.xlu1 %v448_v4  ;;  %419 = vset.pattern.permute.xlu0 %v448_v4  ;;  %v45_v6 = vld [vmem:[%s606_s1] sm:$0xff]  ;;  %v44_v7 = vpack.c.bf16 %v43_v5, %v42_v3  ;;  %vm149_vm2 = vcmask 64512  }
   0x5   :  { %131 = vperm.xlu1 %420, %v117_v1   ;;  %67 = vperm.xlu0 %419, %v53_v2   ;;  %v46_v8 = vpack.c.bf16 %v45_v6, %v45_v6  ;;  %v409_v9 = vld [vmem:[%s607_s2] sm:$0xff] }
   0x6   :  { %421 = vset.pattern.permute.xlu2 %v448_v4  ;;  %99 = vmatpush.bf16.msra.mxu0 %v44_v7  ;;  %v411_v11 = vld [vmem:[%s609_s4] sm:$0xff] }
   0x7   :  { %v158_v10 = vsel %vm156_vm0, %v46_v8, 0  ;;  %v51_v12 = vld [vmem:[%s608_s3] sm:$0xff] }
   0x8   :  { %167 = vmatpush.bf16.msra.mxu1 %v158_v10  ;;  %57 = vperm.xlu2 %421, %v51_v12  }
   0x9   :  { %18 = vsyncpa [#allocation4], 0  ;;  %377 = vmatmul.msk.bf16.vlgmr.msra.gmra.mxu0 %vm85_vm1, %v409_v9  ;;  %v118_v13 = vld [vmem:[%s610_s5 + $0x18] sm:$0xff]  ;;  %v52_v15 = vld [vmem:[%s608_s3 + $0x8] sm:$0xff]  ;;  %vm209_vm3 = vcmask 261120   ;;  %s360_s25 = sshll.u32 %s616_s11, 4  ;;  %s361_s25 = int_to_ptr.hbm [resolvable:$true] %s360_s25 }
   0xa   :  { %v54_v14 = vld [vmem:[%s608_s3 + $0x18] sm:$0xff]  ;;  %v116_v16 = vld [vmem:[%s610_s5 + $0x8] sm:$0xff]  ;;  %v115_v17 = vld [vmem:[%s610_s5] sm:$0xff]  ;;  %vm351_vm4 = vcmask 57344  }
   0xb   :  { %387 = vmatmul.msk.bf16.vlgmr.msra.gmra.mxu1 %vm149_vm2, %v411_v11  ;;  %v410_v18 = vld [vmem:[%s607_s2 + $0x8] sm:$0xff]  ;;  %v270_v19 = vld [vmem:[%s613_s8] sm:$0xff]  ;;  %v272_v21 = vld [vmem:[%s613_s8 + $0x10] sm:$0xff] }
   0xc   :  { %v412_v20 = vld [vmem:[%s609_s4 + $0x8] sm:$0xff]  ;;  %v273_v23 = vld [vmem:[%s613_s8 + $0x18] sm:$0xff]  ;;  %v302_v25 = vld [vmem:[%s614_s9] sm:$0xff] }
   0xd   :  { %136 = vperm.xlu1 %420, %v118_v13   ;;  %72 = vperm.xlu0 %419, %v54_v14   ;;  %v271_v22 = vld [vmem:[%s613_s8 + $0x8] sm:$0xff]  ;;  %v304_v26 = vld [vmem:[%s614_s9 + $0x10] sm:$0xff]  ;;  %v343_v27 = vld [vmem:[#allocation2] sm:$0x1] }
   0xe   :  { %v303_v24 = vld [vmem:[%s614_s9 + $0x8] sm:$0xff]  ;;  %v305_v28 = vld [vmem:[%s614_s9 + $0x18] sm:$0xff]  ;;  %v413_v1 = vld [vmem:[%s611_s6] sm:$0xff] }
   0xf   :  { %v415_v2 = vld [vmem:[%s612_s7] sm:$0xff]  ;;  %v414_v3 = vld [vmem:[%s611_s6 + $0x8] sm:$0xff]  ;;  %s449_s6 = smov [#allocation3]  }
  0x10   :  { %62 = vperm.xlu2 %421, %v52_v15   ;;  %v416_v4 = vld [vmem:[%s612_s7 + $0x8] sm:$0xff]  ;;  %s358_s7 = sshll.u32 %s449_s6, 4  ;;  %s359_s7 = int_to_ptr.vmem [resolvable:$true] %s358_s7 }
  0x15   :  { %126 = vperm.xlu1 %420, %v116_v16   ;;  %121 = vperm.xlu0 %419, %v115_v17  }
  0x18   :  { %276 = vperm.xlu2 %421, %v270_v19  }
  0x19   :  { %378 = vmatmul.msk.bf16.gmra.mxu0 %vm85_vm1, %v410_v18 }
  0x1b   :  { %388 = vmatmul.msk.bf16.gmra.mxu1 %vm149_vm2, %v412_v20 }
  0x1d   :  { %286 = vperm.xlu1 %420, %v272_v21   ;;  %281 = vperm.xlu0 %419, %v271_v22  }
  0x20   :  { %291 = vperm.xlu2 %421, %v273_v23  }
  0x25   :  { %313 = vperm.xlu1 %420, %v303_v24   ;;  %308 = vperm.xlu0 %419, %v302_v25  }
  0x28   :  { %318 = vperm.xlu2 %421, %v304_v26  }
  0x2d   :  { %346 = vperm.xlu1 %420, %v343_v27   ;;  %323 = vperm.xlu0 %419, %v305_v28  }
  0x62   :  { %v58_v35 = vpop.permute.xlu2 %57 }
  0x6a   :  { %v63_v40 = vpop.permute.xlu2 %62 }
  0x72   :  { %v277_v7 = vpop.permute.xlu2 %276 }
  0x77   :  { %v132_v31 = vpop.permute.xlu1 %131  ;;  %v68_v32 = vpop.permute.xlu0 %67 }
  0x7a   :  { %v292_v14 = vpop.permute.xlu2 %291 }
  0x7f   :  { %v137_v36 = vpop.permute.xlu1 %136  ;;  %v73_v37 = vpop.permute.xlu0 %72 }
  0x82   :  { %v319_v28 = vpop.permute.xlu2 %318 }
  0x86   :  { %v101_v29 = vpop.f32.mrf.mxu0 }
  0x87   :  { %v127_v42 = vpop.permute.xlu1 %126  ;;  %v122_v45 = vpop.permute.xlu0 %121  ;;  %v102_v51 = vadd.f32 %v101_v29, %v58_v35 }
  0x88   :  { %v169_v30 = vpop.f32.mrf.mxu1 }
  0x89   :  { %v170_v54 = vadd.f32 %v169_v30, %v122_v45  ;;  %v179_v61 = vmax.f32 %v102_v51, 0.0 }
  0x8b   :  { %v185_v62 = vmax.f32 %v170_v54, 0.0 }
  0x8e   :  { %v103_v33 = vpop.f32.mrf.mxu0 }
  0x8f   :  { %v104_v46 = vadd.f32 %v103_v33, %v63_v40  ;;  %v282_v10 = vpop.permute.xlu0 %281  ;;  %v287_v12 = vpop.permute.xlu1 %286 }
  0x90   :  { %v171_v34 = vpop.f32.mrf.mxu1 }
  0x91   :  { %v172_v49 = vadd.f32 %v171_v34, %v127_v42  ;;  %v180_v57 = vmax.f32 %v104_v46, 0.0 }
  0x93   :  { %v186_v59 = vmax.f32 %v172_v49, 0.0  ;;  %v183_v63 = vpack.c.bf16 %v180_v57, %v179_v61 }
  0x95   :  { %v189_v0 = vpack.c.bf16 %v186_v59, %v185_v62 }
  0x96   :  { %v106_v38 = vpop.f32.mrf.mxu0 }
  0x97   :  { %v107_v41 = vadd.f32 %v106_v38, %v68_v32  ;;  %v309_v22 = vpop.permute.xlu0 %308  ;;  %v314_v25 = vpop.permute.xlu1 %313 }
  0x98   :  { %v174_v39 = vpop.f32.mrf.mxu1 }
  0x99   :  { %v175_v43 = vadd.f32 %v174_v39, %v132_v31  ;;  %v181_v52 = vmax.f32 %v107_v41, 0.0 }
  0x9b   :  { %v187_v55 = vmax.f32 %v175_v43, 0.0 }
  0x9e   :  { %v108_v44 = vpop.f32.mrf.mxu0 }
  0x9f   :  { %v109_v47 = vadd.f32 %v108_v44, %v73_v37  ;;  %v324_v38 = vpop.permute.xlu0 %323 }
  0xa0   :  { %v176_v48 = vpop.f32.mrf.mxu1 }
  0xa1   :  { %v177_v50 = vadd.f32 %v176_v48, %v137_v36  ;;  %v182_v53 = vmax.f32 %v109_v47, 0.0  ;;  %v347_v48 = vpop.permute.xlu1 %346 }
  0xa3   :  { %v188_v56 = vmax.f32 %v177_v50, 0.0  ;;  %v184_v58 = vpack.c.bf16 %v182_v53, %v181_v52  ;;  %v349_v50 = vperm.slane %v347_v48, 0 }
  0xa5   :  { %v190_v60 = vpack.c.bf16 %v188_v56, %v187_v55  ;;  %257 = vmatpush.bf16.msra.mxu3 %v184_v58 }
  0xa7   :  { %222 = vmatpush.bf16.msra.mxu2 %v190_v60 }
  0xa9   :  { %258 = vmatpush.bf16.msra.mxu3 %v183_v63 }
  0xab   :  { %223 = vmatpush.bf16.msra.mxu2 %v189_v0 }
  0xac   :  { %407 = vmatmul.msk.bf16.vlgmr.msra.gmra.mxu3 %vm209_vm3, %v413_v1 }
  0xae   :  { %397 = vmatmul.msk.bf16.vlgmr.msra.gmra.mxu2 %vm209_vm3, %v415_v2 }
  0xbc   :  { %408 = vmatmul.msk.bf16.gmra.mxu3 %vm209_vm3, %v414_v3 }
  0xbe   :  { %398 = vmatmul.msk.bf16.gmra.mxu2 %vm209_vm3, %v416_v4 }
 0x12f   :  { %v260_v5 = vpop.f32.mrf.mxu3 }
 0x131   :  { %v225_v6 = vpop.f32.mrf.mxu2 }
 0x132   :  { %v261_v13 = vadd.f32 %v260_v5, %v225_v6 }
 0x134   :  { %v294_v18 = vadd.f32 %v277_v7, %v261_v13 }
 0x136   :  { %v298_v23 = vmax.f32 %v294_v18, 0.0 }
 0x137   :  { %v262_v8 = vpop.f32.mrf.mxu3 }
 0x138   :  { %v326_v30 = vmul.f32 %v309_v22, %v298_v23 }
 0x139   :  { %v227_v9 = vpop.f32.mrf.mxu2 }
 0x13a   :  { %v263_v11 = vadd.f32 %v262_v8, %v227_v9  ;;  %v330_v35 = vsel %vm149_vm2, %v326_v30, 0.0 }
 0x13c   :  { %v295_v15 = vadd.f32 %v282_v10, %v263_v11 }
 0x13e   :  { %v299_v20 = vmax.f32 %v295_v15, 0.0 }
 0x13f   :  { %v265_v16 = vpop.f32.mrf.mxu3 }
 0x140   :  { %v327_v26 = vmul.f32 %v314_v25, %v299_v20 }
 0x141   :  { %v230_v17 = vpop.f32.mrf.mxu2 }
 0x142   :  { %v266_v19 = vadd.f32 %v265_v16, %v230_v17  ;;  %v331_v33 = vsel %vm149_vm2, %v327_v26, 0.0 }
 0x143   :  { %v332_v39 = vadd.f32 %v331_v33, %v330_v35 }
 0x144   :  { %v296_v21 = vadd.f32 %v287_v12, %v266_v19 }
 0x146   :  { %v300_v24 = vmax.f32 %v296_v21, 0.0 }
 0x147   :  { %v267_v27 = vpop.f32.mrf.mxu3 }
 0x148   :  { %v328_v31 = vmul.f32 %v319_v28, %v300_v24 }
 0x149   :  { %v232_v29 = vpop.f32.mrf.mxu2 }
 0x14a   :  { %v268_v32 = vadd.f32 %v267_v27, %v232_v29  ;;  %v333_v36 = vsel %vm149_vm2, %v328_v31, 0.0 }
 0x14b   :  { %v334_v41 = vadd.f32 %v333_v36, %v332_v39 }
 0x14c   :  { %v297_v34 = vadd.f32 %v292_v14, %v268_v32 }
 0x14e   :  { %v301_v37 = vmax.f32 %v297_v34, 0.0 }
 0x150   :  { %v329_v40 = vmul.f32 %v324_v38, %v301_v37 }
 0x152   :  { %v335_v42 = vsel %vm149_vm2, %v329_v40, 0.0 }
 0x153   :  { %v336_v43 = vadd.f32 %v335_v42, %v334_v41 }
 0x155   :  { %v337_v44 = vrot.slane %v336_v43, 4 }
 0x157   :  { %v338_v45 = vadd.f32 %v337_v44, %v336_v43 }
 0x159   :  { %v339_v46 = vrot.slane %v338_v45, 2 }
 0x15b   :  { %v340_v47 = vadd.f32 %v339_v46, %v338_v45 }
 0x15d   :  { %v341_v49 = vrot.slane %v340_v47, 1 }
 0x15f   :  { %v342_v51 = vadd.f32 %v341_v49, %v340_v47 }
 0x161   :  { %v350_v52 = vadd.f32 %v349_v50, %v342_v51 }
 0x163   :  { %352 = vst.msk [vmem:[#allocation3] sm:$0x1] %vm351_vm4, %v350_v52 }
 0x164   :  { %363 = dma.vmem_to_hbm [thread:$0]  %s359_s7, 16, %s361_s25, [#allocation4]  }
 0x165   :  { %446 = dma.done.wait [#allocation4], 16  }
 0x166   :  { %447 = vsyncadd [#allocation4], 4294967280 }
 0x167   :  { %368 = vsyncpa [#allocation4], 1 }

</bundles_post_ra>
